<compile_context>
chip_gen: v5e
topology: v5e:2x2
jax: 0.10.0
libtpu: 0.0.40
codegen_flags: <defaults>
</compile_context>

<pallas_src>
import jax
import jax.numpy as jnp
from jax.experimental import pallas as pl
from jax.experimental.pallas import tpu as pltpu

_LANE = 128
_SUBLANE = 8
_MAX_L_TILE = 2048                     # multiple of 128
_TARGET_TILE_BYTES = 4 * 1024 * 1024   # moving bytes per grid step (x + unpull)


def _round_up(x, m):
    return ((x + m - 1) // m) * m


def _make_latent_kernel(c_in, l, l_tile, inv_l):
    """Kernel closed over static channel count, length, L tile and 1/L."""
    needs_l_mask = (l % l_tile) != 0

    def kernel(x_ref, w_ref, b_ref, latent_ref, unpull_ref, acc_ref):
        k = pl.program_id(1)
        num_k = pl.num_programs(1)

        x = x_ref[...]                                        # (blk_rows, l_tile)
        if needs_l_mask:
            lane = jax.lax.broadcasted_iota(jnp.int32, x.shape, 1)
            x = jnp.where(k * l_tile + lane < l, x, 0)
        # Partial sum over this L tile with f32 accumulation (no separate
        # full-tile f32 copy for bf16 inputs).
        partial = jnp.sum(x, axis=-1, keepdims=True, dtype=jnp.float32)

        @pl.when(k == 0)
        def _():
            acc_ref[...] = partial

        @pl.when(k > 0)
        def _():
            acc_ref[...] += partial

        @pl.when(k == num_k - 1)
        def _():
            # AdaptiveAvgPool1d(1): sum * precomputed 1/L (no divide).
            row_mean = acc_ref[...] * inv_l                   # (blk_rows, 1) f32
            # Latent at its natural width: tiny masked store, no 128x broadcast.
            latent_ref[...] = row_mean.astype(latent_ref.dtype)

            w = w_ref[...]                                    # (c_in, c_out) f32
            b = b_ref[...]                                    # (1,   c_out) f32
            if c_in == 1:
                # 1x1 conv, one input channel: VPU broadcast multiply-add,
                # no K=1 MXU pass.
                unpull = row_mean * w + b                     # (blk_n, c_out)
            else:
                # TODO(synk): c_in>1 falls back to a small-K MXU dot with an
                # in-kernel (blk_rows,1)->(blk_n,c_in) relayout; the module
                # default (and the tested config) is c_in == 1.
                lat2d = row_mean.reshape(-1, c_in)
                unpull = jnp.dot(lat2d, w,
                                 preferred_element_type=jnp.float32) + b
            unpull_ref[...] = unpull.astype(unpull_ref.dtype)

    return kernel


def prepare_latent_params(weight, bias):
    """Conv1d(k=1) params -> dense matmul form.  Call once, reuse per forward."""
    c_out, c_in, _ = weight.shape
    w2d = jnp.asarray(weight, jnp.float32).reshape(c_out, c_in).T   # (C_in, C_out)
    b2d = jnp.asarray(bias, jnp.float32).reshape(1, c_out)
    return w2d, b2d


def latent_forward(x, w2d, b2d, indices):
    """Pallas equivalent of Latent.forward(X, indices).

    Args:
      x:       (N, C_in, L) array (PyTorch NCL layout), any float dtype.
      w2d:     (C_in, C_out) prepared Conv1d(k=1) weight (see prepare_latent_params).
      b2d:     (1, C_out) prepared bias.
      indices: passed through untouched (as in the reference module).

    Returns:
      (latent, unpull, indices) with latent: (N, C_in), unpull: (N, 1, C_out).
    """
    n, c_in, l = x.shape
    c_in_w, c_out = w2d.shape
    assert c_in_w == c_in, "weight/input channel mismatch"

    out_dtype = x.dtype
    x_itemsize = jnp.dtype(x.dtype).itemsize
    out_itemsize = jnp.dtype(out_dtype).itemsize

    rows = n * c_in
    x2d = x.reshape(rows, l)

    # --- L tiling (reduction axis): bounds VMEM for arbitrarily long series.
    l_tile = l if l <= _MAX_L_TILE else _MAX_L_TILE
    num_l = pl.cdiv(l, l_tile)

    # --- Row tiling (parallel axis): ~_TARGET_TILE_BYTES moved per grid step.
    per_n_bytes = c_in * l_tile * x_itemsize + (c_out + c_in) * out_itemsize
    blk_n = max(1, _TARGET_TILE_BYTES // per_n_bytes)
    if blk_n >= n:
        # Whole batch fits in one tile; split in two once the batch is big
        # enough so v7x's second TensorCore gets work.
        blk_n = n if n < 16 else _round_up(pl.cdiv(n, 2), _SUBLANE)
    else:
        blk_n = max(_SUBLANE, (blk_n // _SUBLANE) * _SUBLANE)
    blk_rows = blk_n * c_in
    num_row_blocks = pl.cdiv(n, blk_n)

    grid = (num_row_blocks, num_l)
    kernel = _make_latent_kernel(c_in, l, l_tile, 1.0 / float(l))

    cost = pl.CostEstimate(
        flops=rows * l + rows + 2 * n * c_in * c_out,
        transcendentals=0,
        bytes_accessed=(x2d.size * x_itemsize
                        + (w2d.size + b2d.size) * 4
                        + rows * out_itemsize
                        + n * c_out * out_itemsize),
    )

    latent2d, unpull2d = pl.pallas_call(
        kernel,
        grid=grid,
        in_specs=[
            pl.BlockSpec((blk_rows, l_tile), lambda i, k: (i, k)),
            pl.BlockSpec((c_in, c_out), lambda i, k: (0, 0)),
            pl.BlockSpec((1, c_out), lambda i, k: (0, 0)),
        ],
        out_specs=[
            pl.BlockSpec((blk_rows, 1), lambda i, k: (i, 0)),
            pl.BlockSpec((blk_n, c_out), lambda i, k: (i, 0)),
        ],
        out_shape=[
            jax.ShapeDtypeStruct((rows, 1), out_dtype),
            jax.ShapeDtypeStruct((n, c_out), out_dtype),
        ],
        scratch_shapes=[pltpu.VMEM((blk_rows, 1), jnp.float32)],
        compiler_params=pltpu.CompilerParams(
            dimension_semantics=("parallel", "arbitrary"),
            vmem_limit_bytes=32 * 1024 * 1024,
        ),
        cost_estimate=cost,
    )(x2d, w2d, b2d)

    latent = latent2d.reshape(n, c_in)
    # TODO(synk): the reference's .squeeze(-1).view(-1, size(2), size(1)) would
    # raise on a 2-D tensor in PyTorch; we emit the evident intent (N, 1, C_out).
    unpull = unpull2d.reshape(n, 1, c_out)
    return latent, unpull, indices


def _check(x, weight, bias, indices):
    n, c_in, l = x.shape
    c_out = weight.shape[0]
    w2d, b2d = prepare_latent_params(weight, bias)
    latent, unpull, idx_out = latent_forward(x, w2d, b2d, indices)
    jax.block_until_ready((latent, unpull, idx_out))

    lat_ref = jnp.mean(x, axis=-1)                                     # (N, C_in)
    unp_ref = (lat_ref @ weight.reshape(c_out, c_in).T + bias).reshape(n, 1, c_out)
    assert latent.shape == (n, c_in) and unpull.shape == (n, 1, c_out)
    assert jnp.allclose(latent, lat_ref, atol=1e-5, rtol=1e-5)
    assert jnp.allclose(unpull, unp_ref, atol=1e-4, rtol=1e-4)
    assert (idx_out == indices).all()


if __name__ == "__main__":
    key = jax.random.PRNGKey(0)
    k_x, k_w, k_b, k_i, k_x2 = jax.random.split(key, 5)

    # Module defaults: input_channels=1, output_channels=178, output_size=1.
    N, C_IN, L, C_OUT = 4, 1, 128, 178
    x = jax.random.normal(k_x, (N, C_IN, L), dtype=jnp.float32)
    weight = 0.1 * jax.random.normal(k_w, (C_OUT, C_IN, 1), dtype=jnp.float32)
    bias = 0.1 * jax.random.normal(k_b, (C_OUT,), dtype=jnp.float32)
    # "indices" are just passed through by the module (e.g. maxpool indices upstream).
    indices = jax.random.randint(k_i, (N, C_IN, L // 2), 0, L)
    _check(x, weight, bias, indices)

    # Second case exercises the L-reduction grid axis + masked L tail
    # (L=3000 > 2048 tile, not a multiple of the tile or of 128).
    N2, L2 = 12, 3000
    x2 = jax.random.normal(k_x2, (N2, C_IN, L2), dtype=jnp.float32)
    indices2 = jax.random.randint(k_i, (N2, C_IN, 8), 0, L2)
    _check(x2, weight, bias, indices2)

    print("KERNEL_OK")
</pallas_src>

<mosaic_0001>
module attributes {stable_mosaic.version = 11 : i64} {
  func.func @kernel(%arg0: i32, %arg1: i32, %arg2: memref<4x128xf32, #tpu.memory_space<vmem>>, %arg3: memref<1x178xf32, #tpu.memory_space<vmem>>, %arg4: memref<1x178xf32, #tpu.memory_space<vmem>>, %arg5: memref<4x1xf32, #tpu.memory_space<vmem>>, %arg6: memref<4x178xf32, #tpu.memory_space<vmem>>, %arg7: memref<4x1xf32, #tpu.memory_space<vmem>>) attributes {dimension_semantics = [#tpu.dimension_semantics<parallel>, #tpu.dimension_semantics<arbitrary>], iteration_bounds = array<i64: 1, 1>, scalar_prefetch = 0 : i64, scratch_operands = 1 : i64, tpu.core_type = #tpu.core_type<tc>, window_params = [{transform_indices = @transform_0, window_bounds = array<i64: 4, 128>}, {pipeline_mode = #tpu.pipeline_mode<synchronous>, transform_indices = @transform_1, window_bounds = array<i64: 1, 178>}, {pipeline_mode = #tpu.pipeline_mode<synchronous>, transform_indices = @transform_2, window_bounds = array<i64: 1, 178>}, {transform_indices = @transform_3, window_bounds = array<i64: 4, 1>}, {transform_indices = @transform_4, window_bounds = array<i64: 4, 178>}]} {
    %c0 = arith.constant 0 : index
    %c0_0 = arith.constant 0 : index
    %0 = vector.load %arg2[%c0, %c0_0] : memref<4x128xf32, #tpu.memory_space<vmem>>, vector<4x128xf32>
    %cst = arith.constant dense<0.000000e+00> : vector<4xf32>
    %1 = vector.multi_reduction <add>, %0, %cst [1] : vector<4x128xf32> to vector<4xf32>
    %2 = vector.shape_cast %1 : vector<4xf32> to vector<4x1xf32>
    %c0_i32 = arith.constant 0 : i32
    %3 = arith.cmpi eq, %arg1, %c0_i32 : i32
    %4 = arith.extui %3 : i1 to i32
    %c0_i32_1 = arith.constant 0 : i32
    %5 = arith.cmpi ne, %4, %c0_i32_1 : i32
    scf.if %5 {
      %c0_6 = arith.constant 0 : index
      %c0_7 = arith.constant 0 : index
      %12 = vector.load %arg7[%c0_6, %c0_7] : memref<4x1xf32, #tpu.memory_space<vmem>>, vector<4x1xf32>
      tpu.vector_store %arg7[%c0_6, %c0_7], %2 {strides = array<i32>} : memref<4x1xf32, #tpu.memory_space<vmem>>, vector<4x1xf32>,
    } else {
    }
    %c0_i32_2 = arith.constant 0 : i32
    %6 = arith.cmpi sgt, %arg1, %c0_i32_2 : i32
    %7 = arith.extui %6 : i1 to i32
    %c0_i32_3 = arith.constant 0 : i32
    %8 = arith.cmpi ne, %7, %c0_i32_3 : i32
    scf.if %8 {
      %c0_6 = arith.constant 0 : index
      %c0_7 = arith.constant 0 : index
      %12 = vector.load %arg7[%c0_6, %c0_7] : memref<4x1xf32, #tpu.memory_space<vmem>>, vector<4x1xf32>
      %13 = arith.addf %12, %2 : vector<4x1xf32>
      %c0_8 = arith.constant 0 : index
      %c0_9 = arith.constant 0 : index
      %14 = vector.load %arg7[%c0_8, %c0_9] : memref<4x1xf32, #tpu.memory_space<vmem>>, vector<4x1xf32>
      tpu.vector_store %arg7[%c0_8, %c0_9], %13 {strides = array<i32>} : memref<4x1xf32, #tpu.memory_space<vmem>>, vector<4x1xf32>,
    } else {
    }
    %c0_i32_4 = arith.constant 0 : i32
    %9 = arith.cmpi eq, %arg1, %c0_i32_4 : i32
    %10 = arith.extui %9 : i1 to i32
    %c0_i32_5 = arith.constant 0 : i32
    %11 = arith.cmpi ne, %10, %c0_i32_5 : i32
    scf.if %11 {
      %c0_6 = arith.constant 0 : index
      %c0_7 = arith.constant 0 : index
      %12 = vector.load %arg7[%c0_6, %c0_7] : memref<4x1xf32, #tpu.memory_space<vmem>>, vector<4x1xf32>
      %cst_8 = arith.constant 7.812500e-03 : f32
      %13 = vector.broadcast %cst_8 : f32 to vector<4x1xf32>
      %14 = arith.mulf %12, %13 : vector<4x1xf32>
      %c0_9 = arith.constant 0 : index
      %c0_10 = arith.constant 0 : index
      %15 = vector.load %arg5[%c0_9, %c0_10] : memref<4x1xf32, #tpu.memory_space<vmem>>, vector<4x1xf32>
      tpu.vector_store %arg5[%c0_9, %c0_10], %14 {strides = array<i32>} : memref<4x1xf32, #tpu.memory_space<vmem>>, vector<4x1xf32>,
      %c0_11 = arith.constant 0 : index
      %c0_12 = arith.constant 0 : index
      %16 = vector.load %arg3[%c0_11, %c0_12] : memref<1x178xf32, #tpu.memory_space<vmem>>, vector<1x178xf32>
      %c0_13 = arith.constant 0 : index
      %c0_14 = arith.constant 0 : index
      %17 = vector.load %arg4[%c0_13, %c0_14] : memref<1x178xf32, #tpu.memory_space<vmem>>, vector<1x178xf32>
      %18 = vector.broadcast %14 : vector<4x1xf32> to vector<4x178xf32>
      %19 = vector.broadcast %16 : vector<1x178xf32> to vector<4x178xf32>
      %20 = arith.mulf %18, %19 : vector<4x178xf32>
      %21 = vector.broadcast %17 : vector<1x178xf32> to vector<4x178xf32>
      %22 = arith.addf %20, %21 : vector<4x178xf32>
      %c0_15 = arith.constant 0 : index
      %c0_16 = arith.constant 0 : index
      %23 = vector.load %arg6[%c0_15, %c0_16] : memref<4x178xf32, #tpu.memory_space<vmem>>, vector<4x178xf32>
      tpu.vector_store %arg6[%c0_15, %c0_16], %22 {strides = array<i32>} : memref<4x178xf32, #tpu.memory_space<vmem>>, vector<4x178xf32>,
    } else {
    }
    return
  }
  func.func @transform_0(%arg0: i32, %arg1: i32) -> (i32, i32) {
    %c0_i32 = arith.constant 0 : i32
    return %arg0, %arg1 : i32, i32
  }
  func.func @transform_1(%arg0: i32, %arg1: i32) -> (i32, i32) {
    %c0_i32 = arith.constant 0 : i32
    %c0_i32_0 = arith.constant 0 : i32
    %c0_i32_1 = arith.constant 0 : i32
    return %c0_i32, %c0_i32_0 : i32, i32
  }
  func.func @transform_2(%arg0: i32, %arg1: i32) -> (i32, i32) {
    %c0_i32 = arith.constant 0 : i32
    %c0_i32_0 = arith.constant 0 : i32
    %c0_i32_1 = arith.constant 0 : i32
    return %c0_i32, %c0_i32_0 : i32, i32
  }
  func.func @transform_3(%arg0: i32, %arg1: i32) -> (i32, i32) {
    %c0_i32 = arith.constant 0 : i32
    %c0_i32_0 = arith.constant 0 : i32
    return %arg0, %c0_i32 : i32, i32
  }
  func.func @transform_4(%arg0: i32, %arg1: i32) -> (i32, i32) {
    %c0_i32 = arith.constant 0 : i32
    %c0_i32_0 = arith.constant 0 : i32
    return %arg0, %c0_i32 : i32, i32
  }
}

</mosaic_0001>

<bundles_post_ra>
// kernel: tpu_custom_call.1
= control target key start
LH: loop header
LB: loop body
LE: loop exit
PB: predicated region body
PF: predicated region fallthrough
CT: control target
= control target key end

     0   :  { %10 = vsyncpa [#allocation4], 0  ;;  %s291_s0 = inlined_call_operand.hbm [shape: f32[4,128], index: 0, kind: input, shape index: {}]   ;;  %s292_s1 = inlined_call_operand.hbm [shape: f32[1,178], index: 1, kind: input, shape index: {}]   ;;  %s293_s2 = inlined_call_operand.hbm [shape: f32[1,178], index: 2, kind: input, shape index: {}]   ;;  %s294_s3 = inlined_call_operand.vmem [shape: f32[4,1], index: 3, kind: output, shape index: {0}]   ;;  %s295_s4 = inlined_call_operand.hbm [shape: f32[4,178], index: 4, kind: output, shape index: {1}]  }
   0x1   :  { %11 = vsyncpa [#allocation7], 0  ;;  %s29_s17 = sshll.u32 %s292_s1, 4  ;;  %s30_s17 = int_to_ptr.hbm [resolvable:$true] %s29_s17 }
   0x2   :  { %12 = vsyncpa [#allocation5], 0  ;;  %s243_s18 = smov [#allocation6]   ;;  %s18_s22 = sshll.u32 %s291_s0, 4  ;;  %s19_s22 = int_to_ptr.hbm [resolvable:$true] %s18_s22 }
   0x3   :  { %s31_s19 = sshll.u32 %s243_s18, 4  ;;  %s244_s23 = smov [#allocation3]   ;;  %s32_s19 = int_to_ptr.vmem [resolvable:$true] %s31_s19 }
   0x4   :  { %34 = dma.hbm_to_vmem [thread:$0]  %s30_s17, 32, %s32_s19, [#allocation7]  }
   0x5   :  { %s20_s24 = sshll.u32 %s244_s23, 4  ;;  %s40_s27 = sshll.u32 %s293_s2, 4  ;;  %s21_s24 = int_to_ptr.vmem [resolvable:$true] %s20_s24  ;;  %s41_s27 = int_to_ptr.hbm [resolvable:$true] %s40_s27 }
   0x6   :  { %23 = dma.hbm_to_vmem [thread:$0]  %s19_s22, 64, %s21_s24, [#allocation4]  }
   0x7   :  { %s245_s1 = smov [#allocation8]  }
   0x8   :  { %s42_s28 = sshll.u32 %s245_s1, 4  ;;  %s43_s28 = int_to_ptr.vmem [resolvable:$true] %s42_s28 }
   0x9   :  { %45 = dma.hbm_to_vmem [thread:$0]  %s41_s27, 32, %s43_s28, [#allocation7]  }
   0xa   :  { %237 = dma.done.wait [#allocation4], 64  }
   0xb   :  { %238 = vsyncadd [#allocation4], 4294967232 }
   0xc   :  { %239 = dma.done.wait [#allocation7], 64  }
   0xd   :  { %240 = vsyncadd [#allocation7], 4294967232  ;;  %vm59_vm0 = vcmask 1043456   ;;  %v58_v0 = vld [vmem:[#allocation3] sm:$0xf]  ;;  %v246_v2 = vmov 0  }
   0xe   :  { %v60_v1 = vsel %vm59_vm0, %v58_v0, 0.0  ;;  %140 = vset.pattern.permute.xlu0 %v246_v2  ;;  %vm67_vm1 = vcmask 3072   ;;  %v84_v6 = vld [vmem:[#allocation6] sm:$0x3]  ;;  %v85_v7 = vld [vmem:[#allocation8] sm:$0x3] }
   0xf   :  { %61 = vadd.xlane.f32.xlu0 %v60_v1  ;;  %v92_v8 = vperm.slane %v84_v6, 0  ;;  %v93_v9 = vperm.slane %v84_v6, 1  ;;  %v100_v10 = vperm.slane %v85_v7, 1  ;;  %v99_v12 = vperm.slane %v85_v7, 0  ;;  %s247_s29 = smov [#allocation9]   ;;  %s122_s7 = sshll.u32 %s295_s4, 4  ;;  %s123_s7 = int_to_ptr.hbm [resolvable:$true] %s122_s7 }
  0x10   :  { %vm110_vm2 = vcmask 408580   ;;  %s120_s30 = sshll.u32 %s247_s29, 4  ;;  %s121_s30 = int_to_ptr.vmem [resolvable:$true] %s120_s30 }
  0x11   :  { %vm111_vm3 = vmor %vm110_vm2, %vm59_vm0 }
  0x82   :  { %v62_v3 = vpop.xlane.xlu0 %61 }
  0x83   :  { %68 = vst.msk [vmem:[#allocation2] sm:$0xf] %vm67_vm1, %v62_v3 }
  0x8a   :  { %v80_v4 = vld [vmem:[#allocation2] sm:$0xf] }
  0x8b   :  { %v81_v5 = vmul.f32 0.0078125, %v80_v4 }
  0x8d   :  { %88 = vperm.xlu0 %140, %v81_v5   ;;  %83 = vst.msk [vmem:[%s294_s3] sm:$0xf] %vm67_vm1, %v81_v5 }
  0xff   :  { %v89_v11 = vpop.permute.xlu0 %88 }
 0x100   :  { %v96_v13 = vmul.f32 %v92_v8, %v89_v11  ;;  %v97_v14 = vmul.f32 %v93_v9, %v89_v11 }
 0x102   :  { %v104_v15 = vadd.f32 %v100_v10, %v97_v14  ;;  %v103_v16 = vadd.f32 %v99_v12, %v96_v13 }
 0x104   :  { %v107_v17 = vrot.slane %v104_v15, 4 }
 0x106   :  { %v108_v18 = vsel %vm59_vm0, %v103_v16, %v107_v17 }
 0x107   :  { %112 = vst.msk [vmem:[#allocation9] sm:$0xff] %vm111_vm3, %v108_v18 }
 0x108   :  { %125 = dma.vmem_to_hbm [thread:$0]  %s121_s30, 128, %s123_s7, [#allocation5]  }
 0x109   :  { %241 = dma.done.wait [#allocation5], 128  }
 0x10a   :  { %242 = vsyncadd [#allocation5], 4294967168 }
 0x10b   :  { %132 = vsyncpa [#allocation4], 1 }
 0x10c   :  { %133 = vsyncpa [#allocation7], 1 }
 0x10d   :  { %134 = vsyncpa [#allocation5], 1 }

</bundles_post_ra>
